<compile_context>
chip_gen: v5e
topology: v5e:2x2
jax: 0.10.0
libtpu: 0.0.40
codegen_flags: <defaults>
</compile_context>

<pallas_src>
import jax
import jax.numpy as jnp
from jax.experimental import pallas as pl
from jax.experimental.pallas import tpu as pltpu


_LANE = 128
_SUBLANE = 8
_TM_MAX = 1024   # max batch-tile rows (review: sweep 512-2048; VMEM stays tiny)


def _round_up(n, m):
    return ((n + m - 1) // m) * m


def _pad2d(x, rows, cols):
    r, c = x.shape
    if (r, c) == (rows, cols):
        return x
    return jnp.pad(x, ((0, rows - r), (0, cols - c)))


def _pad1d(x, n):
    if x.shape[0] == n:
        return x
    return jnp.pad(x, (0, n - x.shape[0]))


# ---------------------------------------------------------------------------
# Fused kernel: one batch tile, all layers chained on-chip.
# ---------------------------------------------------------------------------
def _fcn_kernel(x_ref, *refs):
    """refs = (w1, ..., wL, b_packed, o_ref).

    Per layer: h = relu(h @ W_l + b_l)   (no ReLU on the final layer).
    Accumulation is f32 (preferred_element_type); epilogue stays f32.
    """
    *w_refs, b_ref, o_ref = refs
    n_layers = len(w_refs)

    h = x_ref[...]
    if h.dtype != jnp.float32:
        h = h.astype(jnp.float32)

    for l in range(n_layers):            # unrolled: n_layers is static
        w = w_refs[l][...]
        lhs = h if w.dtype == jnp.float32 else h.astype(w.dtype)
        h = jnp.dot(lhs, w, preferred_element_type=jnp.float32)
        n_l = w.shape[1]                 # this layer's (padded) output width
        h = h + b_ref[l:l + 1, :n_l]     # (tm, n_l) + (1, n_l), f32
        if l < n_layers - 1:             # no ReLU on fc6
            h = jnp.maximum(h, 0.0)

    o_ref[...] = h.astype(o_ref.dtype)   # narrow (n_types-wide) masked store


# ---------------------------------------------------------------------------
# Parameter setup
# ---------------------------------------------------------------------------
def init_fcn_params(key, features, ln1, ln2, ln3, ln4, ln5, total_number_types):
    """PyTorch-style init: U(-1/sqrt(fan_in), 1/sqrt(fan_in)).

    Weights stored as (in_features, out_features) == PyTorch weight.T.
    """
    dims = [features, ln1, ln2, ln3, ln4, ln5, total_number_types]
    params = []
    for idx in range(6):
        fan_in, fan_out = dims[idx], dims[idx + 1]
        key, kw, kb = jax.random.split(key, 3)
        bound = 1.0 / float(fan_in) ** 0.5
        w = jax.random.uniform(kw, (fan_in, fan_out), jnp.float32, -bound, bound)
        b = jax.random.uniform(kb, (fan_out,), jnp.float32, -bound, bound)
        params.append((w, b))
    return params


def prepare_fcn_params(params, *, weights_dtype=jnp.float32):
    """One-time padding/packing, hoisted out of the hot path.

    * Hidden-layer widths are zero-padded to multiples of 128 lanes.  Zero
      padding is exact: padded K rows multiply zero activations, padded output
      columns get weight 0 + bias 0 -> 0, and ReLU keeps them 0.
    * First-layer K stays at `features` (x is passed unpadded) and last-layer
      N stays at `total_number_types` (narrow output stores, no wrapper slice).
    * Biases are packed into one (n_layers, max_padded_N) f32 array: a single
      pallas_call operand instead of six.
    * weights_dtype=jnp.bfloat16 optionally halves weight DMA/VMEM and runs the
      MXU at full rate (f32 accumulation); default f32 matches PyTorch exactly.
    """
    n_layers = len(params)
    dims = [params[0][0].shape[0]] + [w.shape[1] for w, _ in params]

    padded_w, padded_b = [], []
    for l, (w, b) in enumerate(params):
        k_in, n_out = w.shape
        kp = k_in if l == 0 else _round_up(k_in, _LANE)
        np_ = n_out if l == n_layers - 1 else _round_up(n_out, _LANE)
        padded_w.append(_pad2d(w, kp, np_).astype(weights_dtype))
        padded_b.append(_pad1d(b, np_).astype(jnp.float32))

    max_np = max(b.shape[0] for b in padded_b)
    b_packed = jnp.stack([_pad1d(b, max_np) for b in padded_b])  # (L, max_np)
    return padded_w, b_packed, dims


def _vmem_limit_bytes(tm, feat, padded_w, b_packed, n_types):
    """Tight-but-safe scoped VMEM request (portable to v7x's 64 MiB/TC)."""
    f32 = 4
    param_bytes = sum(int(w.size) * w.dtype.itemsize for w in padded_w)
    param_bytes += int(b_packed.size) * b_packed.dtype.itemsize
    x_bytes = tm * feat * f32
    o_bytes = tm * n_types * f32
    max_np = max(w.shape[1] for w in padded_w)
    act_bytes = 3 * tm * max(feat, max_np) * f32      # live f32 intermediates
    # x / out / params get pipeline buffers (params are grid-invariant but
    # still allocated double-buffered since we don't force single-buffering).
    needed = 2 * (param_bytes + x_bytes + o_bytes) + act_bytes
    return int(min(max(needed + (8 << 20), 16 << 20), 32 << 20))


# ---------------------------------------------------------------------------
# Forward pass
# ---------------------------------------------------------------------------
def fcn_forward(prepared, x, *, tm=None):
    """x: (batch, features) f32 -> (batch, total_number_types) f32."""
    padded_w, b_packed, dims = prepared
    M, K = x.shape
    assert K == dims[0], f"expected {dims[0]} features, got {K}"
    n_types = dims[-1]

    if tm is None:
        # ~cdiv(M, 2): >= 2 grid points whenever M > 8 (v7x dual-TC sharding of
        # the "parallel" axis), large tiles (<= _TM_MAX) to amortize the
        # ~0.35 us/grid-step overhead; M >= 512 gives >= 256-row tiles (v6e MXU).
        tm = max(_SUBLANE, min(_TM_MAX, _round_up(pl.cdiv(M, 2), _SUBLANE)))
    else:
        tm = max(_SUBLANE, _round_up(tm, _SUBLANE))

    # Ragged batch handling: the last tile may read out-of-bounds rows (garbage)
    # but every row is independent and OOB output rows are masked on store.
    grid = (pl.cdiv(M, tm),)

    # x block: (tm, K) with K = true feature count (legal: equals full dim).
    in_specs = [pl.BlockSpec((tm, K), lambda i: (i, 0))]
    # Weights: full-array, grid-invariant blocks (DMA'd once, VMEM-resident).
    for w in padded_w:
        in_specs.append(pl.BlockSpec(w.shape, lambda i: (0, 0)))
    # Packed biases: one grid-invariant operand.
    in_specs.append(pl.BlockSpec(b_packed.shape, lambda i: (0, 0)))

    out = pl.pallas_call(
        _fcn_kernel,
        out_shape=jax.ShapeDtypeStruct((M, n_types), x.dtype),   # narrow output
        grid_spec=pltpu.PrefetchScalarGridSpec(
            num_scalar_prefetch=0,
            grid=grid,
            in_specs=in_specs,
            out_specs=pl.BlockSpec((tm, n_types), lambda i: (i, 0)),
        ),
        compiler_params=pltpu.CompilerParams(
            dimension_semantics=("parallel",),
            vmem_limit_bytes=_vmem_limit_bytes(tm, K, padded_w, b_packed, n_types),
        ),
    )(x, *padded_w, b_packed)
    return out


def fcn_forward_ref(params, x):
    h = x
    for idx, (w, b) in enumerate(params):
        h = h @ w + b
        if idx < len(params) - 1:
            h = jnp.maximum(h, 0.0)
    return h


if __name__ == "__main__":
    # Small shapes consistent with the module's constructor arguments.
    features, ln1, ln2, ln3, ln4, ln5, n_types = 96, 64, 48, 40, 32, 24, 5

    key = jax.random.PRNGKey(0)
    key, kx1, kx2 = jax.random.split(key, 3)

    params = init_fcn_params(key, features, ln1, ln2, ln3, ln4, ln5, n_types)
    prepared = prepare_fcn_params(params)   # one-time padding/packing

    # Tiny batch (latency-bound path): a single partial tile.
    x_small = jax.random.normal(kx1, (4, features), jnp.float32)
    out_small = jax.block_until_ready(fcn_forward(prepared, x_small))
    ref_small = fcn_forward_ref(params, x_small)
    assert out_small.shape == (4, n_types)
    assert jnp.allclose(out_small, ref_small, atol=1e-4, rtol=1e-4)

    # Larger batch: 2 grid points (v7x dual-TC path) with a ragged last tile.
    x_big = jax.random.normal(kx2, (260, features), jnp.float32)
    out_big = jax.block_until_ready(fcn_forward(prepared, x_big))
    ref_big = fcn_forward_ref(params, x_big)
    assert out_big.shape == (260, n_types)
    assert jnp.allclose(out_big, ref_big, atol=1e-4, rtol=1e-4)

    print("KERNEL_OK")
</pallas_src>

<mosaic_0001>
module attributes {stable_mosaic.version = 11 : i64} {
  func.func @_fcn_kernel(%arg0: i32, %arg1: memref<8x96xf32, #tpu.memory_space<vmem>>, %arg2: memref<96x128xf32, #tpu.memory_space<vmem>>, %arg3: memref<128x128xf32, #tpu.memory_space<vmem>>, %arg4: memref<128x128xf32, #tpu.memory_space<vmem>>, %arg5: memref<128x128xf32, #tpu.memory_space<vmem>>, %arg6: memref<128x128xf32, #tpu.memory_space<vmem>>, %arg7: memref<128x5xf32, #tpu.memory_space<vmem>>, %arg8: memref<6x128xf32, #tpu.memory_space<vmem>>, %arg9: memref<8x5xf32, #tpu.memory_space<vmem>>) attributes {dimension_semantics = [#tpu.dimension_semantics<parallel>], iteration_bounds = array<i64: 1>, scalar_prefetch = 0 : i64, scratch_operands = 0 : i64, tpu.core_type = #tpu.core_type<tc>, window_params = [{transform_indices = @transform_0, window_bounds = array<i64: 8, 96>}, {pipeline_mode = #tpu.pipeline_mode<synchronous>, transform_indices = @transform_1, window_bounds = array<i64: 96, 128>}, {pipeline_mode = #tpu.pipeline_mode<synchronous>, transform_indices = @transform_2, window_bounds = array<i64: 128, 128>}, {pipeline_mode = #tpu.pipeline_mode<synchronous>, transform_indices = @transform_3, window_bounds = array<i64: 128, 128>}, {pipeline_mode = #tpu.pipeline_mode<synchronous>, transform_indices = @transform_4, window_bounds = array<i64: 128, 128>}, {pipeline_mode = #tpu.pipeline_mode<synchronous>, transform_indices = @transform_5, window_bounds = array<i64: 128, 128>}, {pipeline_mode = #tpu.pipeline_mode<synchronous>, transform_indices = @transform_6, window_bounds = array<i64: 128, 5>}, {pipeline_mode = #tpu.pipeline_mode<synchronous>, transform_indices = @transform_7, window_bounds = array<i64: 6, 128>}, {transform_indices = @transform_8, window_bounds = array<i64: 8, 5>}]} {
    %c0 = arith.constant 0 : index
    %c0_0 = arith.constant 0 : index
    %0 = vector.load %arg1[%c0, %c0_0] : memref<8x96xf32, #tpu.memory_space<vmem>>, vector<8x96xf32>
    %c0_1 = arith.constant 0 : index
    %c0_2 = arith.constant 0 : index
    %1 = vector.load %arg2[%c0_1, %c0_2] : memref<96x128xf32, #tpu.memory_space<vmem>>, vector<96x128xf32>
    %cst = arith.constant dense<0.000000e+00> : vector<8x128xf32>
    %2 = tpu.matmul %0, %1, %cst {dimension_numbers = #tpu.dot_dimension_numbers<[1], [0], [0], [1], [0, 0, 1, 1], [], []>} : vector<8x96xf32>, vector<96x128xf32>, vector<8x128xf32> -> vector<8x128xf32>
    %c0_3 = arith.constant 0 : index
    %c0_4 = arith.constant 0 : index
    %3 = vector.load %arg8[%c0_3, %c0_4] : memref<6x128xf32, #tpu.memory_space<vmem>>, vector<1x128xf32>
    %4 = vector.broadcast %3 : vector<1x128xf32> to vector<8x128xf32>
    %5 = arith.addf %2, %4 : vector<8x128xf32>
    %cst_5 = arith.constant 0.000000e+00 : f32
    %6 = vector.broadcast %cst_5 : f32 to vector<8x128xf32>
    %7 = arith.maximumf %5, %6 : vector<8x128xf32>
    %c0_6 = arith.constant 0 : index
    %c0_7 = arith.constant 0 : index
    %8 = vector.load %arg3[%c0_6, %c0_7] : memref<128x128xf32, #tpu.memory_space<vmem>>, vector<128x128xf32>
    %cst_8 = arith.constant dense<0.000000e+00> : vector<8x128xf32>
    %9 = tpu.matmul %7, %8, %cst_8 {dimension_numbers = #tpu.dot_dimension_numbers<[1], [0], [0], [1], [0, 0, 1, 1], [], []>} : vector<8x128xf32>, vector<128x128xf32>, vector<8x128xf32> -> vector<8x128xf32>
    %c1 = arith.constant 1 : index
    %c0_9 = arith.constant 0 : index
    %10 = vector.load %arg8[%c1, %c0_9] : memref<6x128xf32, #tpu.memory_space<vmem>>, vector<1x128xf32>
    %11 = vector.broadcast %10 : vector<1x128xf32> to vector<8x128xf32>
    %12 = arith.addf %9, %11 : vector<8x128xf32>
    %cst_10 = arith.constant 0.000000e+00 : f32
    %13 = vector.broadcast %cst_10 : f32 to vector<8x128xf32>
    %14 = arith.maximumf %12, %13 : vector<8x128xf32>
    %c0_11 = arith.constant 0 : index
    %c0_12 = arith.constant 0 : index
    %15 = vector.load %arg4[%c0_11, %c0_12] : memref<128x128xf32, #tpu.memory_space<vmem>>, vector<128x128xf32>
    %cst_13 = arith.constant dense<0.000000e+00> : vector<8x128xf32>
    %16 = tpu.matmul %14, %15, %cst_13 {dimension_numbers = #tpu.dot_dimension_numbers<[1], [0], [0], [1], [0, 0, 1, 1], [], []>} : vector<8x128xf32>, vector<128x128xf32>, vector<8x128xf32> -> vector<8x128xf32>
    %c2 = arith.constant 2 : index
    %c0_14 = arith.constant 0 : index
    %17 = vector.load %arg8[%c2, %c0_14] : memref<6x128xf32, #tpu.memory_space<vmem>>, vector<1x128xf32>
    %18 = vector.broadcast %17 : vector<1x128xf32> to vector<8x128xf32>
    %19 = arith.addf %16, %18 : vector<8x128xf32>
    %cst_15 = arith.constant 0.000000e+00 : f32
    %20 = vector.broadcast %cst_15 : f32 to vector<8x128xf32>
    %21 = arith.maximumf %19, %20 : vector<8x128xf32>
    %c0_16 = arith.constant 0 : index
    %c0_17 = arith.constant 0 : index
    %22 = vector.load %arg5[%c0_16, %c0_17] : memref<128x128xf32, #tpu.memory_space<vmem>>, vector<128x128xf32>
    %cst_18 = arith.constant dense<0.000000e+00> : vector<8x128xf32>
    %23 = tpu.matmul %21, %22, %cst_18 {dimension_numbers = #tpu.dot_dimension_numbers<[1], [0], [0], [1], [0, 0, 1, 1], [], []>} : vector<8x128xf32>, vector<128x128xf32>, vector<8x128xf32> -> vector<8x128xf32>
    %c3 = arith.constant 3 : index
    %c0_19 = arith.constant 0 : index
    %24 = vector.load %arg8[%c3, %c0_19] : memref<6x128xf32, #tpu.memory_space<vmem>>, vector<1x128xf32>
    %25 = vector.broadcast %24 : vector<1x128xf32> to vector<8x128xf32>
    %26 = arith.addf %23, %25 : vector<8x128xf32>
    %cst_20 = arith.constant 0.000000e+00 : f32
    %27 = vector.broadcast %cst_20 : f32 to vector<8x128xf32>
    %28 = arith.maximumf %26, %27 : vector<8x128xf32>
    %c0_21 = arith.constant 0 : index
    %c0_22 = arith.constant 0 : index
    %29 = vector.load %arg6[%c0_21, %c0_22] : memref<128x128xf32, #tpu.memory_space<vmem>>, vector<128x128xf32>
    %cst_23 = arith.constant dense<0.000000e+00> : vector<8x128xf32>
    %30 = tpu.matmul %28, %29, %cst_23 {dimension_numbers = #tpu.dot_dimension_numbers<[1], [0], [0], [1], [0, 0, 1, 1], [], []>} : vector<8x128xf32>, vector<128x128xf32>, vector<8x128xf32> -> vector<8x128xf32>
    %c4 = arith.constant 4 : index
    %c0_24 = arith.constant 0 : index
    %31 = vector.load %arg8[%c4, %c0_24] : memref<6x128xf32, #tpu.memory_space<vmem>>, vector<1x128xf32>
    %32 = vector.broadcast %31 : vector<1x128xf32> to vector<8x128xf32>
    %33 = arith.addf %30, %32 : vector<8x128xf32>
    %cst_25 = arith.constant 0.000000e+00 : f32
    %34 = vector.broadcast %cst_25 : f32 to vector<8x128xf32>
    %35 = arith.maximumf %33, %34 : vector<8x128xf32>
    %c0_26 = arith.constant 0 : index
    %c0_27 = arith.constant 0 : index
    %36 = vector.load %arg7[%c0_26, %c0_27] : memref<128x5xf32, #tpu.memory_space<vmem>>, vector<128x5xf32>
    %cst_28 = arith.constant dense<0.000000e+00> : vector<8x5xf32>
    %37 = tpu.matmul %35, %36, %cst_28 {dimension_numbers = #tpu.dot_dimension_numbers<[1], [0], [0], [1], [0, 0, 1, 1], [], []>} : vector<8x128xf32>, vector<128x5xf32>, vector<8x5xf32> -> vector<8x5xf32>
    %c5 = arith.constant 5 : index
    %c0_29 = arith.constant 0 : index
    %38 = vector.load %arg8[%c5, %c0_29] : memref<6x128xf32, #tpu.memory_space<vmem>>, vector<1x5xf32>
    %39 = vector.broadcast %38 : vector<1x5xf32> to vector<8x5xf32>
    %40 = arith.addf %37, %39 : vector<8x5xf32>
    %c0_30 = arith.constant 0 : index
    %c0_31 = arith.constant 0 : index
    %41 = vector.load %arg9[%c0_30, %c0_31] : memref<8x5xf32, #tpu.memory_space<vmem>>, vector<8x5xf32>
    tpu.vector_store %arg9[%c0_30, %c0_31], %40 {strides = array<i32>} : memref<8x5xf32, #tpu.memory_space<vmem>>, vector<8x5xf32>,
    return
  }
  func.func @transform_0(%arg0: i32) -> (i32, i32) {
    %c0_i32 = arith.constant 0 : i32
    %c0_i32_0 = arith.constant 0 : i32
    return %arg0, %c0_i32 : i32, i32
  }
  func.func @transform_1(%arg0: i32) -> (i32, i32) {
    %c0_i32 = arith.constant 0 : i32
    %c0_i32_0 = arith.constant 0 : i32
    %c0_i32_1 = arith.constant 0 : i32
    return %c0_i32, %c0_i32_0 : i32, i32
  }
  func.func @transform_2(%arg0: i32) -> (i32, i32) {
    %c0_i32 = arith.constant 0 : i32
    %c0_i32_0 = arith.constant 0 : i32
    %c0_i32_1 = arith.constant 0 : i32
    return %c0_i32, %c0_i32_0 : i32, i32
  }
  func.func @transform_3(%arg0: i32) -> (i32, i32) {
    %c0_i32 = arith.constant 0 : i32
    %c0_i32_0 = arith.constant 0 : i32
    %c0_i32_1 = arith.constant 0 : i32
    return %c0_i32, %c0_i32_0 : i32, i32
  }
  func.func @transform_4(%arg0: i32) -> (i32, i32) {
    %c0_i32 = arith.constant 0 : i32
    %c0_i32_0 = arith.constant 0 : i32
    %c0_i32_1 = arith.constant 0 : i32
    return %c0_i32, %c0_i32_0 : i32, i32
  }
  func.func @transform_5(%arg0: i32) -> (i32, i32) {
    %c0_i32 = arith.constant 0 : i32
    %c0_i32_0 = arith.constant 0 : i32
    %c0_i32_1 = arith.constant 0 : i32
    return %c0_i32, %c0_i32_0 : i32, i32
  }
  func.func @transform_6(%arg0: i32) -> (i32, i32) {
    %c0_i32 = arith.constant 0 : i32
    %c0_i32_0 = arith.constant 0 : i32
    %c0_i32_1 = arith.constant 0 : i32
    return %c0_i32, %c0_i32_0 : i32, i32
  }
  func.func @transform_7(%arg0: i32) -> (i32, i32) {
    %c0_i32 = arith.constant 0 : i32
    %c0_i32_0 = arith.constant 0 : i32
    %c0_i32_1 = arith.constant 0 : i32
    return %c0_i32, %c0_i32_0 : i32, i32
  }
  func.func @transform_8(%arg0: i32) -> (i32, i32) {
    %c0_i32 = arith.constant 0 : i32
    %c0_i32_0 = arith.constant 0 : i32
    return %arg0, %c0_i32 : i32, i32
  }
}

</mosaic_0001>

<bundles_post_ra>
// kernel: tpu_custom_call.1
= control target key start
LH: loop header
LB: loop body
LE: loop exit
PB: predicated region body
PF: predicated region fallthrough
CT: control target
= control target key end

     0   :  { %13 = vsyncpa [#allocation3], 0  ;;  %s739_s0 = inlined_call_operand.hbm [shape: f32[4,96], index: 0, kind: input, shape index: {}]   ;;  %s740_s1 = inlined_call_operand.hbm [shape: f32[96,128], index: 1, kind: input, shape index: {}]   ;;  %s741_s2 = inlined_call_operand.vmem [shape: f32[128,128], index: 2, kind: input, shape index: {}]   ;;  %s742_s3 = inlined_call_operand.hbm [shape: f32[128,128], index: 3, kind: input, shape index: {}]   ;;  %s743_s4 = inlined_call_operand.hbm [shape: f32[128,128], index: 4, kind: input, shape index: {}]   ;;  %s744_s5 = inlined_call_operand.hbm [shape: f32[128,128], index: 5, kind: input, shape index: {}]   ;;  %s745_s6 = inlined_call_operand.vmem [shape: f32[128,5], index: 6, kind: input, shape index: {}]   ;;  %s746_s7 = inlined_call_operand.vmem [shape: f32[6,128], index: 7, kind: input, shape index: {}]   ;;  %s747_s8 = inlined_call_operand.hbm [shape: f32[4,5], index: 8, kind: output, shape index: {}]  }
   0x1   :  { %14 = vsyncpa [#allocation6], 0 }
   0x2   :  { %15 = vsyncpa [#allocation9], 0 }
   0x3   :  { %16 = vsyncpa [#allocation4], 0  ;;  %s34_s29 = sshll.u32 %s740_s1, 4  ;;  %s35_s29 = int_to_ptr.hbm [resolvable:$true] %s34_s29 }
   0x4   :  { %20 = vsyncadd [#allocation3], 64  ;;  %s534_s30 = smov [#allocation5]   ;;  %s62_s12 = sshll.u32 %s743_s4, 4  ;;  %s63_s12 = int_to_ptr.hbm [resolvable:$true] %s62_s12 }
   0x5   :  { %s36_s9 = sshll.u32 %s534_s30, 4  ;;  %s535_s13 = smov 128   ;;  %s37_s9 = int_to_ptr.vmem [resolvable:$true] %s36_s9 }
   0x6   :  { %s536_s14 = smov 8   ;;  %s537_s15 = smov [#allocation8]  }
   0x7   :  { %42 = dma.hbm_to_vmem [thread:$0]  %s35_s29, 1536, %s37_s9, [#allocation6], %s535_s13, %s535_s13, %s536_s14  }
   0x8   :  { %s64_s16 = sshll.u32 %s537_s15, 4  ;;  %s21_s18 = sshll.u32 %s739_s0, 4  ;;  %s65_s16 = int_to_ptr.vmem [resolvable:$true] %s64_s16  ;;  %s22_s18 = int_to_ptr.hbm [resolvable:$true] %s21_s18 }
   0x9   :  { %70 = dma.hbm_to_vmem [thread:$0]  %s63_s12, 2048, %s65_s16, [#allocation9], %s535_s13, %s535_s13, %s536_s14  }
   0xa   :  { %s538_s4 = smov [#allocation2]   ;;  %s49_s22 = sshll.u32 %s742_s3, 4  ;;  %s50_s22 = int_to_ptr.hbm [resolvable:$true] %s49_s22 }
   0xb   :  { %s23_s19 = sshll.u32 %s538_s4, 4  ;;  %s539_s23 = smov 64   ;;  %s24_s19 = int_to_ptr.vmem [resolvable:$true] %s23_s19 }
   0xc   :  { %s540_s24 = smov 4   ;;  %s541_s0 = smov [#allocation7]  }
   0xd   :  { %29 = dma.hbm_to_vmem [thread:$0]  %s22_s18, 64, %s24_s19, [#allocation3], %s539_s23, %s539_s23, %s540_s24  }
   0xe   :  { %s51_s25 = sshll.u32 %s541_s0, 4  ;;  %s75_s28 = sshll.u32 %s744_s5, 4  ;;  %s52_s25 = int_to_ptr.vmem [resolvable:$true] %s51_s25  ;;  %s76_s28 = int_to_ptr.hbm [resolvable:$true] %s75_s28 }
   0xf   :  { %57 = dma.hbm_to_vmem [thread:$0]  %s50_s22, 2048, %s52_s25, [#allocation6], %s535_s13, %s535_s13, %s536_s14  }
  0x10   :  { %s542_s3 = smov [#allocation10]  }
  0x11   :  { %s77_s29 = sshll.u32 %s542_s3, 4  ;;  %s78_s29 = int_to_ptr.vmem [resolvable:$true] %s77_s29 }
  0x12   :  { %83 = dma.hbm_to_vmem [thread:$0]  %s76_s28, 2048, %s78_s29, [#allocation9], %s535_s13, %s535_s13, %s536_s14  }
  0x13   :  { %526 = dma.done.wait [#allocation3], 128  }
  0x14   :  { %527 = vsyncadd [#allocation3], 4294967168 }
  0x15   :  { %528 = dma.done.wait [#allocation6], 3584  }
  0x16   :  { %529 = vsyncadd [#allocation6], 4294963712 }
  0x17   :  { %530 = dma.done.wait [#allocation9], 4096  }
  0x18   :  { %531 = vsyncadd [#allocation9], 4294963200  ;;  %v120_v0 = vld [vmem:[#allocation5 + $0x58] sm:$0xff]  ;;  %v119_v1 = vld [vmem:[#allocation5 + $0x50] sm:$0xff]  ;;  %vm123_vm0 = vcmask 785408   ;;  %vm342_vm1 = vcmask 39936  }
  0x19   :  { %131 = vmatpush.msra.mxu0 %v120_v0  ;;  %v118_v2 = vld [vmem:[#allocation5 + $0x48] sm:$0xff]  ;;  %v117_v3 = vld [vmem:[#allocation5 + $0x40] sm:$0xff]  ;;  %v163_v4 = vld [vmem:[%s741_s2 + $0x78] sm:$0xff] }
  0x1a   :  { %v162_v5 = vld [vmem:[%s741_s2 + $0x70] sm:$0xff]  ;;  %166 = vmatpush.msra.mxu1 %v163_v4  ;;  %v116_v6 = vld [vmem:[#allocation5 + $0x38] sm:$0xff]  ;;  %v161_v7 = vld [vmem:[%s741_s2 + $0x68] sm:$0xff] }
  0x1b   :  { %132 = vmatpush.msra.mxu0 %v119_v1  ;;  %v115_v8 = vld [vmem:[#allocation5 + $0x30] sm:$0xff]  ;;  %v114_v9 = vld [vmem:[#allocation5 + $0x28] sm:$0xff]  ;;  %v160_v10 = vld [vmem:[%s741_s2 + $0x60] sm:$0xff] }
  0x1c   :  { %167 = vmatpush.msra.mxu1 %v162_v5  ;;  %v159_v11 = vld [vmem:[%s741_s2 + $0x58] sm:$0xff]  ;;  %v113_v12 = vld [vmem:[#allocation5 + $0x20] sm:$0xff]  ;;  %v158_v13 = vld [vmem:[%s741_s2 + $0x50] sm:$0xff] }
  0x1d   :  { %133 = vmatpush.msra.mxu0 %v118_v2  ;;  %v112_v14 = vld [vmem:[#allocation5 + $0x18] sm:$0xff]  ;;  %v157_v15 = vld [vmem:[%s741_s2 + $0x48] sm:$0xff]  ;;  %v111_v16 = vld [vmem:[#allocation5 + $0x10] sm:$0xff] }
  0x1e   :  { %168 = vmatpush.msra.mxu1 %v161_v7  ;;  %v156_v17 = vld [vmem:[%s741_s2 + $0x40] sm:$0xff]  ;;  %v110_v18 = vld [vmem:[#allocation5 + $0x8] sm:$0xff]  ;;  %v155_v19 = vld [vmem:[%s741_s2 + $0x38] sm:$0xff] }
  0x1f   :  { %134 = vmatpush.msra.mxu0 %v117_v3  ;;  %v109_v20 = vld [vmem:[#allocation5] sm:$0xff]  ;;  %v154_v21 = vld [vmem:[%s741_s2 + $0x30] sm:$0xff]  ;;  %v108_v22 = vld [vmem:[#allocation2] sm:$0xff] }
  0x20   :  { %169 = vmatpush.msra.mxu1 %v160_v10  ;;  %v153_v23 = vld [vmem:[%s741_s2 + $0x28] sm:$0xff]  ;;  %v152_v24 = vld [vmem:[%s741_s2 + $0x20] sm:$0xff]  ;;  %v151_v25 = vld [vmem:[%s741_s2 + $0x18] sm:$0xff] }
  0x21   :  { %135 = vmatpush.msra.mxu0 %v116_v6  ;;  %v150_v26 = vld [vmem:[%s741_s2 + $0x10] sm:$0xff]  ;;  %v149_v27 = vld [vmem:[%s741_s2 + $0x8] sm:$0xff]  ;;  %v148_v28 = vld [vmem:[%s741_s2] sm:$0xff] }
  0x22   :  { %170 = vmatpush.msra.mxu1 %v159_v11  ;;  %v202_v29 = vld [vmem:[#allocation7 + $0x78] sm:$0xff]  ;;  %v201_v30 = vld [vmem:[#allocation7 + $0x70] sm:$0xff]  ;;  %v200_v31 = vld [vmem:[#allocation7 + $0x68] sm:$0xff] }
  0x23   :  { %136 = vmatpush.msra.mxu0 %v115_v8  ;;  %205 = vmatpush.msra.mxu2 %v202_v29  ;;  %v199_v32 = vld [vmem:[#allocation7 + $0x60] sm:$0xff]  ;;  %v198_v33 = vld [vmem:[#allocation7 + $0x58] sm:$0xff]  ;;  %v197_v34 = vld [vmem:[#allocation7 + $0x50] sm:$0xff] }
  0x24   :  { %171 = vmatpush.msra.mxu1 %v158_v13  ;;  %v196_v35 = vld [vmem:[#allocation7 + $0x48] sm:$0xff]  ;;  %v195_v36 = vld [vmem:[#allocation7 + $0x40] sm:$0xff]  ;;  %v194_v37 = vld [vmem:[#allocation7 + $0x38] sm:$0xff] }
  0x25   :  { %137 = vmatpush.msra.mxu0 %v114_v9  ;;  %206 = vmatpush.msra.mxu2 %v201_v30  ;;  %v193_v38 = vld [vmem:[#allocation7 + $0x30] sm:$0xff]  ;;  %v192_v39 = vld [vmem:[#allocation7 + $0x28] sm:$0xff]  ;;  %v191_v40 = vld [vmem:[#allocation7 + $0x20] sm:$0xff] }
  0x26   :  { %172 = vmatpush.msra.mxu1 %v157_v15  ;;  %v190_v41 = vld [vmem:[#allocation7 + $0x18] sm:$0xff]  ;;  %v189_v46 = vld [vmem:[#allocation7 + $0x10] sm:$0xff]  ;;  %v188_v47 = vld [vmem:[#allocation7 + $0x8] sm:$0xff] }
  0x27   :  { %138 = vmatpush.msra.mxu0 %v113_v12  ;;  %207 = vmatpush.msra.mxu2 %v200_v31  ;;  %v376_v42 = vld [vmem:[%s746_s7] ss:$0 sm:$0xff]  ;;  %v187_v48 = vld [vmem:[#allocation7] sm:$0xff]  ;;  %v240_v50 = vld [vmem:[#allocation8 + $0x70] sm:$0xff] }
  0x28   :  { %173 = vmatpush.msra.mxu1 %v156_v17  ;;  %v241_v49 = vld [vmem:[#allocation8 + $0x78] sm:$0xff]  ;;  %v239_v51 = vld [vmem:[#allocation8 + $0x68] sm:$0xff]  ;;  %v238_v52 = vld [vmem:[#allocation8 + $0x60] sm:$0xff] }
  0x29   :  { %139 = vmatpush.msra.mxu0 %v112_v14  ;;  %208 = vmatpush.msra.mxu2 %v199_v32  ;;  %v237_v53 = vld [vmem:[#allocation8 + $0x58] sm:$0xff]  ;;  %v236_v54 = vld [vmem:[#allocation8 + $0x50] sm:$0xff]  ;;  %v235_v55 = vld [vmem:[#allocation8 + $0x48] sm:$0xff] }
  0x2a   :  { %174 = vmatpush.msra.mxu1 %v155_v19  ;;  %244 = vmatpush.msra.mxu3 %v241_v49  ;;  %v234_v56 = vld [vmem:[#allocation8 + $0x40] sm:$0xff]  ;;  %v233_v57 = vld [vmem:[#allocation8 + $0x38] sm:$0xff]  ;;  %v232_v58 = vld [vmem:[#allocation8 + $0x30] sm:$0xff] }
  0x2b   :  { %140 = vmatpush.msra.mxu0 %v111_v16  ;;  %209 = vmatpush.msra.mxu2 %v198_v33  ;;  %v231_v59 = vld [vmem:[#allocation8 + $0x28] sm:$0xff]  ;;  %v230_v60 = vld [vmem:[#allocation8 + $0x20] sm:$0xff]  ;;  %v229_v61 = vld [vmem:[#allocation8 + $0x18] sm:$0xff] }
  0x2c   :  { %175 = vmatpush.msra.mxu1 %v154_v21  ;;  %245 = vmatpush.msra.mxu3 %v240_v50  ;;  %v377_v62 = vld [vmem:[%s746_s7 + $0x1] ss:$0 sm:$0xff]  ;;  %v228_v2 = vld [vmem:[#allocation8 + $0x10] sm:$0xff]  ;;  %v227_v3 = vld [vmem:[#allocation8 + $0x8] sm:$0xff] }
  0x2d   :  { %141 = vmatpush.msra.mxu0 %v110_v18  ;;  %210 = vmatpush.msra.mxu2 %v197_v34  ;;  %v226_v4 = vld [vmem:[#allocation8] sm:$0xff]  ;;  %v280_v5 = vld [vmem:[#allocation10 + $0x78] sm:$0xff]  ;;  %v279_v6 = vld [vmem:[#allocation10 + $0x70] sm:$0xff] }
  0x2e   :  { %176 = vmatpush.msra.mxu1 %v153_v23  ;;  %246 = vmatpush.msra.mxu3 %v239_v51  ;;  %v278_v7 = vld [vmem:[#allocation10 + $0x68] sm:$0xff]  ;;  %v277_v8 = vld [vmem:[#allocation10 + $0x60] sm:$0xff]  ;;  %v276_v9 = vld [vmem:[#allocation10 + $0x58] sm:$0xff] }
  0x2f   :  { %142 = vmatpush.msra.mxu0 %v109_v20  ;;  %211 = vmatpush.msra.mxu2 %v196_v35  ;;  %v275_v10 = vld [vmem:[#allocation10 + $0x50] sm:$0xff]  ;;  %v274_v11 = vld [vmem:[#allocation10 + $0x48] sm:$0xff]  ;;  %v273_v12 = vld [vmem:[#allocation10 + $0x40] sm:$0xff] }
  0x30   :  { %365 = vmatmul.msk.f32.vlgmr.msra.gmra.mxu0 %vm123_vm0, %v108_v22  ;;  %177 = vmatpush.msra.mxu1 %v152_v24  ;;  %v272_v13 = vld [vmem:[#allocation10 + $0x38] sm:$0xff]  ;;  %v271_v14 = vld [vmem:[#allocation10 + $0x30] sm:$0xff]  ;;  %v270_v15 = vld [vmem:[#allocation10 + $0x28] sm:$0xff] }
  0x31   :  { %212 = vmatpush.msra.mxu2 %v195_v36  ;;  %247 = vmatpush.msra.mxu3 %v238_v52  ;;  %v269_v16 = vld [vmem:[#allocation10 + $0x20] sm:$0xff]  ;;  %v268_v17 = vld [vmem:[#allocation10 + $0x18] sm:$0xff]  ;;  %v267_v22 = vld [vmem:[#allocation10 + $0x10] sm:$0xff] }
  0x32   :  { %178 = vmatpush.msra.mxu1 %v151_v25  ;;  %283 = vmatpush.msrb.mxu0 %v280_v5  ;;  %v378_v18 = vld [vmem:[%s746_s7 + $0x2] ss:$0 sm:$0xff]  ;;  %v266_v23 = vld [vmem:[#allocation10 + $0x8] sm:$0xff]  ;;  %v265_v24 = vld [vmem:[#allocation10] sm:$0xff] }
  0x33   :  { %213 = vmatpush.msra.mxu2 %v194_v37  ;;  %248 = vmatpush.msra.mxu3 %v237_v53  ;;  %v319_v25 = vld [vmem:[%s745_s6 + $0x78] sm:$0xff]  ;;  %v314_v30 = vld [vmem:[%s745_s6 + $0x50] sm:$0xff]  ;;  %v313_v31 = vld [vmem:[%s745_s6 + $0x48] sm:$0xff] }
  0x34   :  { %179 = vmatpush.msra.mxu1 %v150_v26  ;;  %284 = vmatpush.msrb.mxu0 %v279_v6  ;;  %v318_v26 = vld [vmem:[%s745_s6 + $0x70] sm:$0xff]  ;;  %v315_v29 = vld [vmem:[%s745_s6 + $0x58] sm:$0xff]  ;;  %v312_v32 = vld [vmem:[%s745_s6 + $0x40] sm:$0xff] }
  0x35   :  { %214 = vmatpush.msra.mxu2 %v193_v38  ;;  %249 = vmatpush.msra.mxu3 %v236_v54  ;;  %v311_v33 = vld [vmem:[%s745_s6 + $0x38] sm:$0xff]  ;;  %v310_v34 = vld [vmem:[%s745_s6 + $0x30] sm:$0xff]  ;;  %v309_v35 = vld [vmem:[%s745_s6 + $0x28] sm:$0xff] }
  0x36   :  { %180 = vmatpush.msra.mxu1 %v149_v27  ;;  %285 = vmatpush.msrb.mxu0 %v278_v7  ;;  %v317_v27 = vld [vmem:[%s745_s6 + $0x68] sm:$0xff]  ;;  %v308_v36 = vld [vmem:[%s745_s6 + $0x20] sm:$0xff]  ;;  %v307_v37 = vld [vmem:[%s745_s6 + $0x18] sm:$0xff] }
  0x37   :  { %215 = vmatpush.msra.mxu2 %v192_v39  ;;  %250 = vmatpush.msra.mxu3 %v235_v55  ;;  %v379_v38 = vld [vmem:[%s746_s7 + $0x3] ss:$0 sm:$0xff]  ;;  %v381_v49 = vld [vmem:[%s746_s7 + $0x5] ss:$0 sm:$0xff] }
  0x38   :  { %181 = vmatpush.msra.mxu1 %v148_v28  ;;  %286 = vmatpush.msrb.mxu0 %v277_v8  ;;  %v316_v28 = vld [vmem:[%s745_s6 + $0x60] sm:$0xff] }
  0x39   :  { %216 = vmatpush.msra.mxu2 %v191_v40  ;;  %251 = vmatpush.msra.mxu3 %v234_v56 }
  0x3a   :  { %287 = vmatpush.msrb.mxu0 %v276_v9  ;;  %322 = vmatpush.msrb.mxu1 %v319_v25 }
  0x3b   :  { %217 = vmatpush.msra.mxu2 %v190_v41  ;;  %252 = vmatpush.msra.mxu3 %v233_v57 }
  0x3c   :  { %288 = vmatpush.msrb.mxu0 %v275_v10  ;;  %323 = vmatpush.msrb.mxu1 %v318_v26 }
  0x3d   :  { %218 = vmatpush.msra.mxu2 %v189_v46  ;;  %253 = vmatpush.msra.mxu3 %v232_v58 }
  0x3e   :  { %289 = vmatpush.msrb.mxu0 %v274_v11  ;;  %324 = vmatpush.msrb.mxu1 %v317_v27 }
  0x3f   :  { %219 = vmatpush.msra.mxu2 %v188_v47  ;;  %254 = vmatpush.msra.mxu3 %v231_v59 }
  0x40   :  { %290 = vmatpush.msrb.mxu0 %v273_v12  ;;  %325 = vmatpush.msrb.mxu1 %v316_v28 }
  0x41   :  { %220 = vmatpush.msra.mxu2 %v187_v48  ;;  %255 = vmatpush.msra.mxu3 %v230_v60 }
  0x42   :  { %291 = vmatpush.msrb.mxu0 %v272_v13  ;;  %326 = vmatpush.msrb.mxu1 %v315_v29 }
  0x43   :  { %256 = vmatpush.msra.mxu3 %v229_v61 }
  0x44   :  { %292 = vmatpush.msrb.mxu0 %v271_v14  ;;  %327 = vmatpush.msrb.mxu1 %v314_v30 }
  0x45   :  { %257 = vmatpush.msra.mxu3 %v228_v2 }
  0x46   :  { %293 = vmatpush.msrb.mxu0 %v270_v15  ;;  %328 = vmatpush.msrb.mxu1 %v313_v31 }
  0x47   :  { %258 = vmatpush.msra.mxu3 %v227_v3 }
  0x48   :  { %294 = vmatpush.msrb.mxu0 %v269_v16  ;;  %329 = vmatpush.msrb.mxu1 %v312_v32 }
  0x49   :  { %259 = vmatpush.msra.mxu3 %v226_v4 }
  0x4a   :  { %295 = vmatpush.msrb.mxu0 %v268_v17  ;;  %330 = vmatpush.msrb.mxu1 %v311_v33 }
  0x4c   :  { %296 = vmatpush.msrb.mxu0 %v267_v22  ;;  %331 = vmatpush.msrb.mxu1 %v310_v34 }
  0x4e   :  { %297 = vmatpush.msrb.mxu0 %v266_v23  ;;  %332 = vmatpush.msrb.mxu1 %v309_v35 }
  0x50   :  { %298 = vmatpush.msrb.mxu0 %v265_v24  ;;  %333 = vmatpush.msrb.mxu1 %v308_v36 }
  0x52   :  { %334 = vmatpush.msrb.mxu1 %v307_v37 }
  0xad   :  { %v144_v43 = vpop.f32.mrf.mxu0 }
  0xae   :  { %v145_v44 = vadd.f32 %v376_v42, %v144_v43  ;;  %v306_v42 = vld [vmem:[%s745_s6 + $0x10] sm:$0xff]  ;;  %v305_v43 = vld [vmem:[%s745_s6 + $0x8] sm:$0xff] }
  0xaf   :  { %335 = vmatpush.msrb.mxu1 %v306_v42 }
  0xb0   :  { %v147_v45 = vmax.f32 %v145_v44, 0.0  ;;  %v304_v44 = vld [vmem:[%s745_s6] sm:$0xff] }
  0xb1   :  { %336 = vmatpush.msrb.mxu1 %v305_v43 }
  0xb2   :  { %182 = vmatmul.f32.vlgmr.msra.gmra.mxu1 %v147_v45  ;;  %v380_v45 = vld [vmem:[%s746_s7 + $0x4] ss:$0 sm:$0xff] }
  0xb3   :  { %337 = vmatpush.msrb.mxu1 %v304_v44 }
 0x12f   :  { %v183_v63 = vpop.f32.mrf.mxu1 }
 0x130   :  { %v184_v0 = vadd.f32 %v377_v62, %v183_v63 }
 0x132   :  { %v186_v1 = vmax.f32 %v184_v0, 0.0 }
 0x134   :  { %221 = vmatmul.f32.vlgmr.msra.gmra.mxu2 %v186_v1 }
 0x1b7   :  { %v222_v19 = vpop.f32.mrf.mxu2 }
 0x1b8   :  { %v223_v20 = vadd.f32 %v378_v18, %v222_v19 }
 0x1ba   :  { %v225_v21 = vmax.f32 %v223_v20, 0.0 }
 0x1bc   :  { %260 = vmatmul.f32.vlgmr.msra.gmra.mxu3 %v225_v21 }
 0x23f   :  { %v261_v39 = vpop.f32.mrf.mxu3 }
 0x240   :  { %v262_v40 = vadd.f32 %v379_v38, %v261_v39 }
 0x242   :  { %v264_v41 = vmax.f32 %v262_v40, 0.0 }
 0x244   :  { %299 = vmatmul.f32.vlgmr.msrb.gmra.mxu0 %v264_v41 }
 0x2c1   :  { %v300_v46 = vpop.f32.mrf.mxu0 }
 0x2c2   :  { %v301_v47 = vadd.f32 %v380_v45, %v300_v46 }
 0x2c4   :  { %v303_v48 = vmax.f32 %v301_v47, 0.0 }
 0x2c6   :  { %338 = vmatmul.f32.vlgmr.msrb.gmra.mxu1 %v303_v48 }
 0x343   :  { %v339_v50 = vpop.f32.mrf.mxu1 }
 0x344   :  { %v340_v51 = vadd.f32 %v381_v49, %v339_v50 }
 0x346   :  { %343 = vst.msk [vmem:[#allocation11] sm:$0xff] %vm342_vm1, %v340_v51 }
 0x347   :  { %347 = vsyncadd [#allocation4], 64  ;;  %s350_s5 = sshll.u32 %s747_s8, 4  ;;  %s543_s30 = smov [#allocation11]   ;;  %s351_s5 = int_to_ptr.hbm [resolvable:$true] %s350_s5 }
 0x348   :  { %s348_s9 = sshll.u32 %s543_s30, 4  ;;  %s349_s9 = int_to_ptr.vmem [resolvable:$true] %s348_s9 }
 0x349   :  { %356 = dma.vmem_to_hbm [thread:$0]  %s349_s9, 64, %s351_s5, [#allocation4], %s539_s23, %s539_s23, %s540_s24  }
 0x34a   :  { %532 = dma.done.wait [#allocation4], 128  }
 0x34b   :  { %533 = vsyncadd [#allocation4], 4294967168 }
 0x34c   :  { %361 = vsyncpa [#allocation3], 1 }
 0x34d   :  { %362 = vsyncpa [#allocation6], 1 }
 0x34e   :  { %363 = vsyncpa [#allocation9], 1 }
 0x34f   :  { %364 = vsyncpa [#allocation4], 1 }

</bundles_post_ra>
